<compile_context>
chip_gen: v5e
topology: v5e:2x2
jax: 0.10.0
libtpu: 0.0.40
codegen_flags: <defaults>
</compile_context>

<pallas_src>
import functools

import jax
import jax.numpy as jnp
from jax import lax
from jax.experimental import pallas as pl
from jax.experimental.pallas import tpu as pltpu


def _round_up(v, m):
    return (v + m - 1) // m * m


def _masked_log_softmax(h2, out_dim):
    """log_softmax over the first `out_dim` columns; padded lanes are ignored."""
    tm, out_pad = h2.shape
    col = lax.broadcasted_iota(jnp.int32, (tm, out_pad), 1)
    valid = col < out_dim
    h2m = jnp.where(valid, h2, jnp.float32(-1e30))
    m = jnp.max(h2m, axis=1, keepdims=True)
    z = h2m - m
    p = jnp.where(valid, jnp.exp(z), 0.0)
    lse = jnp.log(jnp.sum(p, axis=1, keepdims=True))
    return z - lse


# ---------------------------------------------------------------------------
# Fused single-tile kernel (whole padded graph fits in one row tile):
# conv1 + relu + conv2 + log_softmax, A read once, no HBM round-trip for h1/t.
# ---------------------------------------------------------------------------
def _sage_fused_kernel(a_ref, x_ref, w1l_ref, b1_ref, w1r_ref,
                       w2l_ref, b2_ref, w2r_ref, out_ref, *, out_dim):
    bf16 = jnp.bfloat16
    a = a_ref[...]                          # [N_pad, N_pad] bf16
    x = x_ref[...]                          # [N_pad, D_in]  bf16

    # conv1: (A @ x) @ w1l + x @ w1r + b1 ; relu
    agg1 = jnp.dot(a, x, preferred_element_type=jnp.float32)
    h1 = (jnp.dot(agg1.astype(bf16), w1l_ref[...],
                  preferred_element_type=jnp.float32)
          + jnp.dot(x, w1r_ref[...], preferred_element_type=jnp.float32)
          + b1_ref[...])
    h1 = jnp.maximum(h1, 0.0).astype(bf16)  # padded hidden cols stay exactly 0

    # TODO(synk): training-mode F.dropout (p=0.5 random mask) not reproduced;
    #             eval/inference semantics (identity) are used here.

    # conv2 reassociated: A @ (h1 @ w2l) + h1 @ w2r + b2
    t = jnp.dot(h1, w2l_ref[...], preferred_element_type=jnp.float32).astype(bf16)
    h2 = (jnp.dot(a, t, preferred_element_type=jnp.float32)
          + jnp.dot(h1, w2r_ref[...], preferred_element_type=jnp.float32)
          + b2_ref[...])

    out_ref[...] = _masked_log_softmax(h2, out_dim)


# ---------------------------------------------------------------------------
# Pass 1 (general path): h1 = relu(lin_l1(A @ x) + lin_r1(x)); also
# t = h1 @ w2l (reassociated conv2 left branch, computable row-wise).
# ---------------------------------------------------------------------------
def _sage_pass1_kernel(a_ref, xfull_ref, xtile_ref,
                       w1l_ref, b1_ref, w1r_ref, w2l_ref,
                       h1_ref, t_ref):
    bf16 = jnp.bfloat16
    a = a_ref[...]                         # [tm, N_pad]  bf16
    x_full = xfull_ref[...]                # [N_pad, D_in] bf16 (resident)
    x_tile = xtile_ref[...]                # [tm, D_in]   bf16

    # conv1 keeps (A @ x) @ w1l order: the N^2 matmul has the narrow D_in width.
    agg1 = jnp.dot(a, x_full, preferred_element_type=jnp.float32)        # [tm, D_in]
    h1 = (jnp.dot(agg1.astype(bf16), w1l_ref[...],
                  preferred_element_type=jnp.float32)
          + jnp.dot(x_tile, w1r_ref[...], preferred_element_type=jnp.float32)
          + b1_ref[...])                                                 # [tm, H_pad]
    h1 = jnp.maximum(h1, 0.0)              # relu (padded cols stay exactly 0)

    # TODO(synk): training-mode F.dropout (p=0.5 random mask) not reproduced;
    #             eval/inference semantics (identity) are used here.

    h1_bf = h1.astype(bf16)
    h1_ref[...] = h1_bf
    # conv2 reassociated: t = h1 @ w2l so pass 2's N^2 matmul is A @ t.
    t_ref[...] = jnp.dot(h1_bf, w2l_ref[...],
                         preferred_element_type=jnp.float32).astype(bf16)


# ---------------------------------------------------------------------------
# Pass 2 (general path): h2 = A @ t + lin_r2(h1) + b2 ; masked log_softmax.
# ---------------------------------------------------------------------------
def _sage_pass2_kernel(a_ref, tfull_ref, h1tile_ref, w2r_ref, b2_ref,
                       out_ref, *, out_dim):
    h2 = (jnp.dot(a_ref[...], tfull_ref[...], preferred_element_type=jnp.float32)
          + jnp.dot(h1tile_ref[...], w2r_ref[...], preferred_element_type=jnp.float32)
          + b2_ref[...])                                   # [tm, OUT_pad] f32
    out_ref[...] = _masked_log_softmax(h2, out_dim)


def sage_forward(x, edge_index, params, *, tm_max=256, fuse_max=512):
    """x: [N, D_in] float32, edge_index: [2, E] int32 (row 0 = src j, row 1 = dst i)."""
    n, d_in = x.shape
    w1l, b1, w1r, w2l, b2, w2r = params
    hidden = w1l.shape[1]
    out_dim = w2l.shape[1]

    # ---- tiling / lane padding ---------------------------------------------
    hid_pad = _round_up(hidden, 128)
    out_pad = _round_up(out_dim, 128)
    fused = n <= fuse_max
    if fused:
        n_pad = _round_up(n, 8)
        tm = n_pad
    elif n <= tm_max:
        n_pad = _round_up(n, 8)
        tm = n_pad
    else:
        tm = tm_max
        n_pad = _round_up(n, tm)
    n_tiles = n_pad // tm

    # ---- glue: dense row-normalized mean-aggregation matrix (bf16) ----------
    src = edge_index[0].astype(jnp.int32)
    dst = edge_index[1].astype(jnp.int32)
    # TODO(synk): dense A is O(N^2); a sparse scalar-prefetch/CSR segment-sum
    #             design is the right long-term path for large real graphs.
    a = jnp.zeros((n_pad, n_pad), jnp.float32).at[dst, src].add(1.0)
    deg = jnp.sum(a, axis=1, keepdims=True)
    a = (a / jnp.maximum(deg, 1.0)).astype(jnp.bfloat16)

    x_p = jnp.zeros((n_pad, d_in), jnp.bfloat16).at[:n].set(x.astype(jnp.bfloat16))

    bf16 = jnp.bfloat16
    w1l_p = jnp.zeros((d_in, hid_pad), bf16).at[:, :hidden].set(w1l.astype(bf16))
    w1r_p = jnp.zeros((d_in, hid_pad), bf16).at[:, :hidden].set(w1r.astype(bf16))
    b1_p = jnp.zeros((1, hid_pad), jnp.float32).at[:, :hidden].set(b1)
    w2l_p = jnp.zeros((hid_pad, out_pad), bf16).at[:hidden, :out_dim].set(w2l.astype(bf16))
    w2r_p = jnp.zeros((hid_pad, out_pad), bf16).at[:hidden, :out_dim].set(w2r.astype(bf16))
    b2_p = jnp.zeros((1, out_pad), jnp.float32).at[:, :out_dim].set(b2)

    # =========================================================================
    # Small-graph fast path: everything in one pallas_call, A read once.
    # =========================================================================
    if fused:
        vmem_est = (
            n_pad * n_pad * 2                                   # A
            + n_pad * d_in * 2                                  # x
            + (2 * d_in * hid_pad + 2 * hid_pad * out_pad) * 2  # weights (bf16)
            + (hid_pad + out_pad) * 4                           # biases (f32)
            + n_pad * out_pad * 4                               # out (f32)
            + n_pad * (hid_pad + out_pad) * 2                   # h1 / t temporaries
            + n_pad * hid_pad * 4                               # f32 temp headroom
        )
        vmem_limit = int(min(max(4 * vmem_est, 16 * 1024 * 1024), 64 * 1024 * 1024))
        cost = pl.CostEstimate(
            flops=2 * n_pad * n_pad * (d_in + out_pad)
                  + 4 * n_pad * d_in * hid_pad
                  + 4 * n_pad * hid_pad * out_pad,
            transcendentals=n_pad * out_pad,
            bytes_accessed=n_pad * n_pad * 2 + n_pad * d_in * 2
                           + n_pad * out_pad * 4
                           + (2 * d_in * hid_pad + 2 * hid_pad * out_pad) * 2,
        )
        full = lambda r, c: pl.BlockSpec((r, c), lambda i: (0, 0))
        out_full = pl.pallas_call(
            functools.partial(_sage_fused_kernel, out_dim=out_dim),
            out_shape=jax.ShapeDtypeStruct((n_pad, out_pad), jnp.float32),
            grid=(1,),
            in_specs=[full(n_pad, n_pad),          # A
                      full(n_pad, d_in),           # x
                      full(d_in, hid_pad),         # w1l
                      full(1, hid_pad),            # b1
                      full(d_in, hid_pad),         # w1r
                      full(hid_pad, out_pad),      # w2l
                      full(1, out_pad),            # b2
                      full(hid_pad, out_pad)],     # w2r
            out_specs=full(n_pad, out_pad),
            compiler_params=pltpu.CompilerParams(
                dimension_semantics=("arbitrary",),
                vmem_limit_bytes=vmem_limit),
            cost_estimate=cost,
        )(a, x_p, w1l_p, b1_p, w1r_p, w2l_p, b2_p, w2r_p)
        return out_full[:n, :out_dim]

    # =========================================================================
    # General path: two row-tiled passes (conv2 needs all of h1).
    # =========================================================================
    vmem_est = (
        2 * tm * n_pad * 2                      # A row tile, 2-deep, bf16
        + n_pad * d_in * 2 + tm * d_in * 2      # resident x + x tile
        + n_pad * out_pad * 2                   # resident t (pass 2)
        + 2 * tm * hid_pad * 2                  # h1 tile input (pass 2)
        + (2 * d_in * hid_pad + 2 * hid_pad * out_pad) * 2     # weights (bf16)
        + (hid_pad + out_pad) * 4                              # biases (f32)
        + 2 * (tm * hid_pad * 2 + tm * out_pad * 2 + tm * out_pad * 4)  # outputs
    )
    vmem_limit = int(min(max(4 * vmem_est, 16 * 1024 * 1024), 48 * 1024 * 1024))

    cp = pltpu.CompilerParams(dimension_semantics=("parallel",),
                              vmem_limit_bytes=vmem_limit)

    a_tile_spec = pl.BlockSpec((tm, n_pad), lambda i: (i, 0))

    # ---- pass 1: conv1 + relu + (h1 @ w2l) ----------------------------------
    cost1 = pl.CostEstimate(
        flops=2 * n_pad * n_pad * d_in
              + 4 * n_pad * d_in * hid_pad
              + 2 * n_pad * hid_pad * out_pad,
        transcendentals=0,
        bytes_accessed=n_pad * n_pad * 2 + 2 * n_pad * d_in * 2
                       + n_pad * hid_pad * 2 + n_pad * out_pad * 2,
    )
    h1, t = pl.pallas_call(
        _sage_pass1_kernel,
        out_shape=(jax.ShapeDtypeStruct((n_pad, hid_pad), jnp.bfloat16),
                   jax.ShapeDtypeStruct((n_pad, out_pad), jnp.bfloat16)),
        grid=(n_tiles,),
        in_specs=[a_tile_spec,
                  pl.BlockSpec((n_pad, d_in), lambda i: (0, 0)),    # x resident
                  pl.BlockSpec((tm, d_in), lambda i: (i, 0)),       # x row tile
                  pl.BlockSpec((d_in, hid_pad), lambda i: (0, 0)),  # w1l
                  pl.BlockSpec((1, hid_pad), lambda i: (0, 0)),     # b1
                  pl.BlockSpec((d_in, hid_pad), lambda i: (0, 0)),  # w1r
                  pl.BlockSpec((hid_pad, out_pad), lambda i: (0, 0))],  # w2l
        out_specs=(pl.BlockSpec((tm, hid_pad), lambda i: (i, 0)),
                   pl.BlockSpec((tm, out_pad), lambda i: (i, 0))),
        compiler_params=cp,
        cost_estimate=cost1,
    )(a, x_p, x_p, w1l_p, b1_p, w1r_p, w2l_p)

    # ---- pass 2: conv2 (A @ t + h1 @ w2r + b2) + masked log_softmax ----------
    cost2 = pl.CostEstimate(
        flops=2 * n_pad * n_pad * out_pad + 2 * n_pad * hid_pad * out_pad,
        transcendentals=n_pad * out_pad,
        bytes_accessed=n_pad * n_pad * 2 + n_pad * out_pad * 2
                       + n_pad * hid_pad * 2 + n_pad * out_pad * 4,
    )
    out_full = pl.pallas_call(
        functools.partial(_sage_pass2_kernel, out_dim=out_dim),
        out_shape=jax.ShapeDtypeStruct((n_pad, out_pad), jnp.float32),
        grid=(n_tiles,),
        in_specs=[a_tile_spec,
                  pl.BlockSpec((n_pad, out_pad), lambda i: (0, 0)),  # t resident
                  pl.BlockSpec((tm, hid_pad), lambda i: (i, 0)),     # h1 row tile
                  pl.BlockSpec((hid_pad, out_pad), lambda i: (0, 0)),  # w2r
                  pl.BlockSpec((1, out_pad), lambda i: (0, 0))],       # b2
        out_specs=pl.BlockSpec((tm, out_pad), lambda i: (i, 0)),
        compiler_params=cp,
        cost_estimate=cost2,
    )(a, t, h1, w2r_p, b2_p)

    return out_full[:n, :out_dim]


def init_sage_params(key, input_dim, hidden_dim, output_dim):
    """Deterministic PyTorch-Linear-style init. Weights stored transposed: [in, out]."""
    ks = jax.random.split(key, 6)

    def lin_w(k, fan_in, fan_out):
        bound = 1.0 / jnp.sqrt(jnp.float32(fan_in))
        return jax.random.uniform(k, (fan_in, fan_out), jnp.float32, -bound, bound)

    def lin_b(k, fan_in, fan_out):
        bound = 1.0 / jnp.sqrt(jnp.float32(fan_in))
        return jax.random.uniform(k, (1, fan_out), jnp.float32, -bound, bound)

    w1l = lin_w(ks[0], input_dim, hidden_dim)    # conv1.lin_l (bias=True)
    b1 = lin_b(ks[1], input_dim, hidden_dim)
    w1r = lin_w(ks[2], input_dim, hidden_dim)    # conv1.lin_r (bias=False)
    w2l = lin_w(ks[3], hidden_dim, output_dim)   # conv2.lin_l (bias=True)
    b2 = lin_b(ks[4], hidden_dim, output_dim)
    w2r = lin_w(ks[5], hidden_dim, output_dim)   # conv2.lin_r (bias=False)
    return (w1l, b1, w1r, w2l, b2, w2r)


if __name__ == "__main__":
    key = jax.random.PRNGKey(0)
    k_x, k_e, k_p = jax.random.split(key, 3)

    num_nodes = 64
    input_dim = 16
    hidden_dim = 64      # fixed by the module (SAGEConv(input_dim, 64))
    output_dim = 8
    num_edges = 256

    x = jax.random.normal(k_x, (num_nodes, input_dim), jnp.float32)
    edge_index = jax.random.randint(k_e, (2, num_edges), 0, num_nodes, jnp.int32)
    params = init_sage_params(k_p, input_dim, hidden_dim, output_dim)

    out = sage_forward(x, edge_index, params)
    out = jax.block_until_ready(out)

    assert out.shape == (num_nodes, output_dim)
    assert bool(jnp.all(jnp.isfinite(out)))
    # log_softmax rows should (approximately) sum to 1 in prob space.
    row_sums = jnp.sum(jnp.exp(out), axis=1)
    assert bool(jnp.all(jnp.abs(row_sums - 1.0) < 1e-4))

    print("KERNEL_OK")
</pallas_src>

<mosaic_0001>
module attributes {stable_mosaic.version = 11 : i64} {
  func.func @_sage_fused_kernel(%arg0: i32, %arg1: memref<64x64xbf16, #tpu.memory_space<vmem>>, %arg2: memref<64x16xbf16, #tpu.memory_space<vmem>>, %arg3: memref<16x128xbf16, #tpu.memory_space<vmem>>, %arg4: memref<1x128xf32, #tpu.memory_space<vmem>>, %arg5: memref<16x128xbf16, #tpu.memory_space<vmem>>, %arg6: memref<128x128xbf16, #tpu.memory_space<vmem>>, %arg7: memref<1x128xf32, #tpu.memory_space<vmem>>, %arg8: memref<128x128xbf16, #tpu.memory_space<vmem>>, %arg9: memref<64x128xf32, #tpu.memory_space<vmem>>) attributes {dimension_semantics = [#tpu.dimension_semantics<arbitrary>], iteration_bounds = array<i64: 1>, scalar_prefetch = 0 : i64, scratch_operands = 0 : i64, tpu.core_type = #tpu.core_type<tc>, window_params = [{pipeline_mode = #tpu.pipeline_mode<synchronous>, transform_indices = @transform_0, window_bounds = array<i64: 64, 64>}, {pipeline_mode = #tpu.pipeline_mode<synchronous>, transform_indices = @transform_1, window_bounds = array<i64: 64, 16>}, {pipeline_mode = #tpu.pipeline_mode<synchronous>, transform_indices = @transform_2, window_bounds = array<i64: 16, 128>}, {pipeline_mode = #tpu.pipeline_mode<synchronous>, transform_indices = @transform_3, window_bounds = array<i64: 1, 128>}, {pipeline_mode = #tpu.pipeline_mode<synchronous>, transform_indices = @transform_4, window_bounds = array<i64: 16, 128>}, {pipeline_mode = #tpu.pipeline_mode<synchronous>, transform_indices = @transform_5, window_bounds = array<i64: 128, 128>}, {pipeline_mode = #tpu.pipeline_mode<synchronous>, transform_indices = @transform_6, window_bounds = array<i64: 1, 128>}, {pipeline_mode = #tpu.pipeline_mode<synchronous>, transform_indices = @transform_7, window_bounds = array<i64: 128, 128>}, {pipeline_mode = #tpu.pipeline_mode<synchronous>, transform_indices = @transform_8, window_bounds = array<i64: 64, 128>}]} {
    %c0 = arith.constant 0 : index
    %c0_0 = arith.constant 0 : index
    %0 = vector.load %arg1[%c0, %c0_0] : memref<64x64xbf16, #tpu.memory_space<vmem>>, vector<64x64xbf16>
    %c0_1 = arith.constant 0 : index
    %c0_2 = arith.constant 0 : index
    %1 = vector.load %arg2[%c0_1, %c0_2] : memref<64x16xbf16, #tpu.memory_space<vmem>>, vector<64x16xbf16>
    %cst = arith.constant dense<0.000000e+00> : vector<64x16xf32>
    %2 = tpu.matmul %0, %1, %cst {dimension_numbers = #tpu.dot_dimension_numbers<[1], [0], [0], [1], [0, 0, 1, 1], [], []>} : vector<64x64xbf16>, vector<64x16xbf16>, vector<64x16xf32> -> vector<64x16xf32>
    %3 = arith.truncf %2 : vector<64x16xf32> to vector<64x16xbf16>
    %c0_3 = arith.constant 0 : index
    %c0_4 = arith.constant 0 : index
    %4 = vector.load %arg3[%c0_3, %c0_4] : memref<16x128xbf16, #tpu.memory_space<vmem>>, vector<16x128xbf16>
    %cst_5 = arith.constant dense<0.000000e+00> : vector<64x128xf32>
    %5 = tpu.matmul %3, %4, %cst_5 {dimension_numbers = #tpu.dot_dimension_numbers<[1], [0], [0], [1], [0, 0, 1, 1], [], []>} : vector<64x16xbf16>, vector<16x128xbf16>, vector<64x128xf32> -> vector<64x128xf32>
    %c0_6 = arith.constant 0 : index
    %c0_7 = arith.constant 0 : index
    %6 = vector.load %arg5[%c0_6, %c0_7] : memref<16x128xbf16, #tpu.memory_space<vmem>>, vector<16x128xbf16>
    %cst_8 = arith.constant dense<0.000000e+00> : vector<64x128xf32>
    %7 = tpu.matmul %1, %6, %cst_8 {dimension_numbers = #tpu.dot_dimension_numbers<[1], [0], [0], [1], [0, 0, 1, 1], [], []>} : vector<64x16xbf16>, vector<16x128xbf16>, vector<64x128xf32> -> vector<64x128xf32>
    %8 = arith.addf %5, %7 : vector<64x128xf32>
    %c0_9 = arith.constant 0 : index
    %c0_10 = arith.constant 0 : index
    %9 = vector.load %arg4[%c0_9, %c0_10] : memref<1x128xf32, #tpu.memory_space<vmem>>, vector<1x128xf32>
    %10 = vector.broadcast %9 : vector<1x128xf32> to vector<64x128xf32>
    %11 = arith.addf %8, %10 : vector<64x128xf32>
    %cst_11 = arith.constant 0.000000e+00 : f32
    %12 = vector.broadcast %cst_11 : f32 to vector<64x128xf32>
    %13 = arith.maximumf %11, %12 : vector<64x128xf32>
    %14 = arith.truncf %13 : vector<64x128xf32> to vector<64x128xbf16>
    %c0_12 = arith.constant 0 : index
    %c0_13 = arith.constant 0 : index
    %15 = vector.load %arg6[%c0_12, %c0_13] : memref<128x128xbf16, #tpu.memory_space<vmem>>, vector<128x128xbf16>
    %cst_14 = arith.constant dense<0.000000e+00> : vector<64x128xf32>
    %16 = tpu.matmul %14, %15, %cst_14 {dimension_numbers = #tpu.dot_dimension_numbers<[1], [0], [0], [1], [0, 0, 1, 1], [], []>} : vector<64x128xbf16>, vector<128x128xbf16>, vector<64x128xf32> -> vector<64x128xf32>
    %17 = arith.truncf %16 : vector<64x128xf32> to vector<64x128xbf16>
    %cst_15 = arith.constant dense<0.000000e+00> : vector<64x128xf32>
    %18 = tpu.matmul %0, %17, %cst_15 {dimension_numbers = #tpu.dot_dimension_numbers<[1], [0], [0], [1], [0, 0, 1, 1], [], []>} : vector<64x64xbf16>, vector<64x128xbf16>, vector<64x128xf32> -> vector<64x128xf32>
    %c0_16 = arith.constant 0 : index
    %c0_17 = arith.constant 0 : index
    %19 = vector.load %arg8[%c0_16, %c0_17] : memref<128x128xbf16, #tpu.memory_space<vmem>>, vector<128x128xbf16>
    %cst_18 = arith.constant dense<0.000000e+00> : vector<64x128xf32>
    %20 = tpu.matmul %14, %19, %cst_18 {dimension_numbers = #tpu.dot_dimension_numbers<[1], [0], [0], [1], [0, 0, 1, 1], [], []>} : vector<64x128xbf16>, vector<128x128xbf16>, vector<64x128xf32> -> vector<64x128xf32>
    %21 = arith.addf %18, %20 : vector<64x128xf32>
    %c0_19 = arith.constant 0 : index
    %c0_20 = arith.constant 0 : index
    %22 = vector.load %arg7[%c0_19, %c0_20] : memref<1x128xf32, #tpu.memory_space<vmem>>, vector<1x128xf32>
    %23 = vector.broadcast %22 : vector<1x128xf32> to vector<64x128xf32>
    %24 = arith.addf %21, %23 : vector<64x128xf32>
    %25 = tpu.iota {dimensions = array<i32: 1>} : vector<64x128xi32>
    %c8_i32 = arith.constant 8 : i32
    %26 = vector.broadcast %c8_i32 : i32 to vector<64x128xi32>
    %27 = arith.cmpi slt, %25, %26 : vector<64x128xi32>
    %cst_21 = arith.constant -1.000000e+30 : f32
    %28 = vector.broadcast %cst_21 : f32 to vector<64x128xf32>
    %29 = arith.select %27, %24, %28 : vector<64x128xi1>, vector<64x128xf32>
    %cst_22 = arith.constant dense<0xFF800000> : vector<64xf32>
    %30 = vector.multi_reduction <maximumf>, %29, %cst_22 [1] : vector<64x128xf32> to vector<64xf32>
    %31 = vector.shape_cast %30 : vector<64xf32> to vector<64x1xf32>
    %32 = vector.broadcast %31 : vector<64x1xf32> to vector<64x128xf32>
    %33 = arith.subf %29, %32 : vector<64x128xf32>
    %34 = math.exp %33 : vector<64x128xf32>
    %cst_23 = arith.constant 0.000000e+00 : f32
    %35 = vector.broadcast %cst_23 : f32 to vector<64x128xf32>
    %36 = arith.select %27, %34, %35 : vector<64x128xi1>, vector<64x128xf32>
    %cst_24 = arith.constant dense<0.000000e+00> : vector<64xf32>
    %37 = vector.multi_reduction <add>, %36, %cst_24 [1] : vector<64x128xf32> to vector<64xf32>
    %38 = vector.shape_cast %37 : vector<64xf32> to vector<64x1xf32>
    %39 = math.log %38 : vector<64x1xf32>
    %40 = vector.broadcast %39 : vector<64x1xf32> to vector<64x128xf32>
    %41 = arith.subf %33, %40 : vector<64x128xf32>
    %c0_25 = arith.constant 0 : index
    %c0_26 = arith.constant 0 : index
    %42 = vector.load %arg9[%c0_25, %c0_26] : memref<64x128xf32, #tpu.memory_space<vmem>>, vector<64x128xf32>
    tpu.vector_store %arg9[%c0_25, %c0_26], %41 {strides = array<i32>} : memref<64x128xf32, #tpu.memory_space<vmem>>, vector<64x128xf32>,
    return
  }
  func.func @transform_0(%arg0: i32) -> (i32, i32) {
    %c0_i32 = arith.constant 0 : i32
    %c0_i32_0 = arith.constant 0 : i32
    %c0_i32_1 = arith.constant 0 : i32
    return %c0_i32, %c0_i32_0 : i32, i32
  }
  func.func @transform_1(%arg0: i32) -> (i32, i32) {
    %c0_i32 = arith.constant 0 : i32
    %c0_i32_0 = arith.constant 0 : i32
    %c0_i32_1 = arith.constant 0 : i32
    return %c0_i32, %c0_i32_0 : i32, i32
  }
  func.func @transform_2(%arg0: i32) -> (i32, i32) {
    %c0_i32 = arith.constant 0 : i32
    %c0_i32_0 = arith.constant 0 : i32
    %c0_i32_1 = arith.constant 0 : i32
    return %c0_i32, %c0_i32_0 : i32, i32
  }
  func.func @transform_3(%arg0: i32) -> (i32, i32) {
    %c0_i32 = arith.constant 0 : i32
    %c0_i32_0 = arith.constant 0 : i32
    %c0_i32_1 = arith.constant 0 : i32
    return %c0_i32, %c0_i32_0 : i32, i32
  }
  func.func @transform_4(%arg0: i32) -> (i32, i32) {
    %c0_i32 = arith.constant 0 : i32
    %c0_i32_0 = arith.constant 0 : i32
    %c0_i32_1 = arith.constant 0 : i32
    return %c0_i32, %c0_i32_0 : i32, i32
  }
  func.func @transform_5(%arg0: i32) -> (i32, i32) {
    %c0_i32 = arith.constant 0 : i32
    %c0_i32_0 = arith.constant 0 : i32
    %c0_i32_1 = arith.constant 0 : i32
    return %c0_i32, %c0_i32_0 : i32, i32
  }
  func.func @transform_6(%arg0: i32) -> (i32, i32) {
    %c0_i32 = arith.constant 0 : i32
    %c0_i32_0 = arith.constant 0 : i32
    %c0_i32_1 = arith.constant 0 : i32
    return %c0_i32, %c0_i32_0 : i32, i32
  }
  func.func @transform_7(%arg0: i32) -> (i32, i32) {
    %c0_i32 = arith.constant 0 : i32
    %c0_i32_0 = arith.constant 0 : i32
    %c0_i32_1 = arith.constant 0 : i32
    return %c0_i32, %c0_i32_0 : i32, i32
  }
  func.func @transform_8(%arg0: i32) -> (i32, i32) {
    %c0_i32 = arith.constant 0 : i32
    %c0_i32_0 = arith.constant 0 : i32
    %c0_i32_1 = arith.constant 0 : i32
    return %c0_i32, %c0_i32_0 : i32, i32
  }
}

</mosaic_0001>

<bundles_post_ra>
// kernel: tpu_custom_call.1
= control target key start
LH: loop header
LB: loop body
LE: loop exit
PB: predicated region body
PF: predicated region fallthrough
CT: control target
= control target key end

     0   :  { %13 = vsyncpa [#allocation3], 0  ;;  %s1130_s0 = inlined_call_operand.vmem [shape: bf16[64,64], index: 0, kind: input, shape index: {}]   ;;  %s1131_s1 = inlined_call_operand.vmem [shape: bf16[64,16], index: 1, kind: input, shape index: {}]   ;;  %s1132_s2 = inlined_call_operand.vmem [shape: bf16[16,128], index: 2, kind: input, shape index: {}]   ;;  %s1133_s3 = inlined_call_operand.vmem [shape: f32[1,128], index: 3, kind: input, shape index: {}]   ;;  %s1134_s4 = inlined_call_operand.hbm [shape: bf16[16,128], index: 4, kind: input, shape index: {}]   ;;  %s1135_s5 = inlined_call_operand.hbm [shape: bf16[128,128], index: 5, kind: input, shape index: {}]   ;;  %s1136_s6 = inlined_call_operand.vmem [shape: f32[1,128], index: 6, kind: input, shape index: {}]   ;;  %s1137_s7 = inlined_call_operand.hbm [shape: bf16[128,128], index: 7, kind: input, shape index: {}]   ;;  %s1138_s8 = inlined_call_operand.hbm [shape: f32[64,128], index: 8, kind: output, shape index: {}]  }
   0x1   :  { %14 = vsyncpa [#allocation6], 0 }
   0x2   :  { %15 = vsyncpa [#allocation4], 0  ;;  %s41_s29 = sshll.u32 %s1135_s5, 4  ;;  %s957_s30 = smov [#allocation5]   ;;  %s42_s29 = int_to_ptr.hbm [resolvable:$true] %s41_s29 }
   0x3   :  { %s43_s9 = sshll.u32 %s957_s30, 4  ;;  %s28_s12 = sshll.u32 %s1134_s4, 4  ;;  %s44_s9 = int_to_ptr.vmem [resolvable:$true] %s43_s9  ;;  %s29_s12 = int_to_ptr.hbm [resolvable:$true] %s28_s12 }
   0x4   :  { %s958_s13 = smov 64   ;;  %s959_s14 = smov 4  }
   0x5   :  { %49 = dma.hbm_to_vmem [thread:$0]  %s42_s29, 1024, %s44_s9, [#allocation6], %s958_s13, %s958_s13, %s959_s14  }
   0x6   :  { %s960_s15 = smov [#allocation2]   ;;  %s56_s19 = sshll.u32 %s1137_s7, 4  ;;  %s57_s19 = int_to_ptr.hbm [resolvable:$true] %s56_s19 }
   0x7   :  { %s30_s16 = sshll.u32 %s960_s15, 4  ;;  %s961_s5 = smov [#allocation7]   ;;  %s31_s16 = int_to_ptr.vmem [resolvable:$true] %s30_s16 }
   0x8   :  { %36 = dma.hbm_to_vmem [thread:$0]  %s29_s12, 128, %s31_s16, [#allocation3], %s958_s13, %s958_s13, %s959_s14  }
   0x9   :  { %s58_s20 = sshll.u32 %s961_s5, 4  ;;  %s59_s20 = int_to_ptr.vmem [resolvable:$true] %s58_s20 }
   0xa   :  { %64 = dma.hbm_to_vmem [thread:$0]  %s57_s19, 1024, %s59_s20, [#allocation6], %s958_s13, %s958_s13, %s959_s14  }
   0xb   :  { %951 = dma.done.wait [#allocation3], 128  }
   0xc   :  { %952 = vsyncadd [#allocation3], 4294967168 }
   0xd   :  { %953 = dma.done.wait [#allocation6], 2048  }
   0xe   :  { %954 = vsyncadd [#allocation6], 4294965248  ;;  %v792_v0 = vld [vmem:[%s1131_s1 + $0x18] sm:$0xff]  ;;  %v791_v1 = vld [vmem:[%s1131_s1 + $0x10] sm:$0xff]  ;;  %vm138_vm0 = vcmask 523264   ;;  %vm194_vm1 = vcmask 130048  }
   0xf   :  { %155 = vmatpush.bf16.msra.mxu0 %v792_v0  ;;  %v790_v2 = vld [vmem:[%s1131_s1 + $0x8] sm:$0xff]  ;;  %v789_v3 = vld [vmem:[%s1131_s1] sm:$0xff]  ;;  %v1048_v7 = vld [vmem:[%s1130_s0 + $0x10] sm:$0xff]  ;;  %s651_s18 = sshll.u32 %s1138_s8, 4  ;;  %s963_s19 = smov 128   ;;  %s652_s18 = int_to_ptr.hbm [resolvable:$true] %s651_s18 }
  0x10   :  { %v1034_v4 = vld [vmem:[%s1130_s0] sm:$0xff]  ;;  %v1041_v5 = vld [vmem:[%s1130_s0 + $0x8] sm:$0xff]  ;;  %v1055_v8 = vld [vmem:[%s1130_s0 + $0x18] sm:$0xff]  ;;  %s964_s5 = smov 8  }
  0x11   :  { %v794_v6 = vld [vmem:[#allocation2] sm:$0xff]  ;;  %v801_v18 = vld [vmem:[#allocation5 + $0x30] sm:$0xff]  ;;  %v800_v26 = vld [vmem:[#allocation5 + $0x28] sm:$0xff] }
  0x12   :  { %811 = vmatpush.bf16.msra.mxu1 %v794_v6  ;;  %v793_v9 = vld [vmem:[%s1132_s2] sm:$0xff]  ;;  %v809_v19 = vld [vmem:[#allocation7 + $0x30] sm:$0xff]  ;;  %v808_v27 = vld [vmem:[#allocation7 + $0x28] sm:$0xff] }
  0x13   :  { %156 = vmatpush.bf16.msra.mxu0 %v791_v1  ;;  %261 = vmatpush.bf16.msra.mxu2 %v793_v9  ;;  %v802_v16 = vld [vmem:[#allocation5 + $0x38] sm:$0xff]  ;;  %v799_v28 = vld [vmem:[#allocation5 + $0x20] sm:$0xff]  ;;  %v797_v32 = vld [vmem:[#allocation5 + $0x10] sm:$0xff] }
  0x14   :  { %812 = vmatpush.bf16.msra.mxu3 %v793_v9  ;;  %v810_v17 = vld [vmem:[#allocation7 + $0x38] sm:$0xff]  ;;  %v807_v29 = vld [vmem:[#allocation7 + $0x20] sm:$0xff]  ;;  %v805_v33 = vld [vmem:[#allocation7 + $0x10] sm:$0xff] }
  0x15   :  { %707 = vmatmul.msk.bf16.vlgmr.msra.gmra.mxu1 %vm194_vm1, %v791_v1  ;;  %v798_v30 = vld [vmem:[#allocation5 + $0x18] sm:$0xff]  ;;  %v796_v34 = vld [vmem:[#allocation5 + $0x8] sm:$0xff]  ;;  %v795_v36 = vld [vmem:[#allocation5] sm:$0xff] }
  0x16   :  { %468 = vmatpush.bf16.msrb.mxu1 %v810_v17  ;;  %v806_v31 = vld [vmem:[#allocation7 + $0x18] sm:$0xff]  ;;  %v804_v35 = vld [vmem:[#allocation7 + $0x8] sm:$0xff]  ;;  %v803_v37 = vld [vmem:[#allocation7] sm:$0xff] }
  0x17   :  { %157 = vmatpush.bf16.msra.mxu0 %v790_v2  ;;  %v821_v42 = vld [vmem:[%s1133_s3] ss:$0 sm:$0xff] }
  0x18   :  { %371 = vmatpush.bf16.msrb.mxu3 %v802_v16 }
  0x1a   :  { %469 = vmatpush.bf16.msrb.mxu1 %v809_v19 }
  0x1b   :  { %158 = vmatpush.bf16.msra.mxu0 %v789_v3 }
  0x1c   :  { %372 = vmatpush.bf16.msrb.mxu3 %v801_v18 }
  0x1e   :  { %697 = vmatmul.msk.bf16.vlgmr.msra.gmra.mxu0 %vm138_vm0, %v1034_v4  ;;  %470 = vmatpush.bf16.msrb.mxu1 %v808_v27 }
  0x1f   :  { %214 = vmatpush.bf16.msrb.mxu0 %v794_v6 }
  0x20   :  { %373 = vmatpush.bf16.msrb.mxu3 %v800_v26 }
  0x22   :  { %471 = vmatpush.bf16.msrb.mxu1 %v807_v29 }
  0x24   :  { %374 = vmatpush.bf16.msrb.mxu3 %v799_v28 }
  0x25   :  { %708 = vmatmul.msk.bf16.gmra.mxu1 %vm194_vm1, %v792_v0 }
  0x26   :  { %472 = vmatpush.bf16.msrb.mxu1 %v806_v31 }
  0x28   :  { %375 = vmatpush.bf16.msrb.mxu3 %v798_v30 }
  0x2a   :  { %473 = vmatpush.bf16.msrb.mxu1 %v805_v33 }
  0x2c   :  { %376 = vmatpush.bf16.msrb.mxu3 %v797_v32 }
  0x2e   :  { %698 = vmatmul.msk.bf16.gmra.mxu0 %vm138_vm0, %v1041_v5  ;;  %474 = vmatpush.bf16.msrb.mxu1 %v804_v35 }
  0x30   :  { %377 = vmatpush.bf16.msrb.mxu3 %v796_v34 }
  0x32   :  { %475 = vmatpush.bf16.msrb.mxu1 %v803_v37 }
  0x34   :  { %378 = vmatpush.bf16.msrb.mxu3 %v795_v36  ;;  %v538_v36 = vlaneseq }
  0x3e   :  { %699 = vmatmul.msk.bf16.gmra.mxu0 %vm138_vm0, %v1048_v7 }
  0x4e   :  { %700 = vmatmul.msk.bf16.gmra.mxu0 %vm138_vm0, %v1055_v8 }
  0x5e   :  { %705 = vmatmul.msk.bf16.vlgmr.msrb.gmra.mxu0 %vm194_vm1, %v789_v3 }
  0x6e   :  { %706 = vmatmul.msk.bf16.gmra.mxu0 %vm194_vm1, %v790_v2 }
  0x92   :  { %v226_v57 = vpop.f32.mrf.mxu1 }
  0x9a   :  { %v228_v63 = vpop.f32.mrf.mxu1 }
  0x9b   :  { %v160_v10 = vpop.f32.mrf.mxu0 }
  0xa3   :  { %v162_v11 = vpop.f32.mrf.mxu0 }
  0xa4   :  { %v180_v12 = vpack.c.bf16 %v162_v11, %v160_v10  ;;  %v231_v11 = vpop.f32.mrf.mxu1 }
  0xa6   :  { %713 = vmatmul.msk.bf16.vlgmr.msra.gmra.mxu2 %vm194_vm1, %v180_v12 }
  0xab   :  { %v165_v13 = vpop.f32.mrf.mxu0 }
  0xb3   :  { %v167_v14 = vpop.f32.mrf.mxu0 }
  0xb4   :  { %v181_v15 = vpack.c.bf16 %v167_v14, %v165_v13 }
  0xb6   :  { %714 = vmatmul.msk.bf16.gmra.mxu2 %vm194_vm1, %v181_v15  ;;  %v233_v15 = vpop.f32.mrf.mxu1 }
  0xbb   :  { %v170_v20 = vpop.f32.mrf.mxu0 }
  0xc3   :  { %v172_v21 = vpop.f32.mrf.mxu0 }
  0xc4   :  { %v182_v22 = vpack.c.bf16 %v172_v21, %v170_v20 }
  0xc6   :  { %715 = vmatmul.msk.bf16.vlgmr.msra.gmra.mxu3 %vm194_vm1, %v182_v22 }
  0xcb   :  { %v175_v23 = vpop.f32.mrf.mxu0 }
  0xd3   :  { %v177_v24 = vpop.f32.mrf.mxu0 }
  0xd4   :  { %v183_v25 = vpack.c.bf16 %v177_v24, %v175_v23 }
  0xd6   :  { %716 = vmatmul.msk.bf16.gmra.mxu3 %vm194_vm1, %v183_v25 }
  0xdb   :  { %v216_v38 = vpop.f32.mrf.mxu0 }
  0xe3   :  { %v218_v40 = vpop.f32.mrf.mxu0 }
  0xeb   :  { %v221_v49 = vpop.f32.mrf.mxu0 }
  0xf3   :  { %v223_v53 = vpop.f32.mrf.mxu0 }
 0x129   :  { %v263_v39 = vpop.f32.mrf.mxu2 }
 0x12a   :  { %v264_v41 = vadd.f32 %v263_v39, %v216_v38  ;;  %v1081_v38 = vand.u32 127, %v538_v36  ;;  %v822_v39 = vld [vmem:[%s1136_s6] ss:$0 sm:$0xff]  ;;  %s962_s6 = smov [#allocation8]  }
 0x12b   :  { %s649_s15 = sshll.u32 %s962_s6, 4  ;;  %s650_s15 = int_to_ptr.vmem [resolvable:$true] %s649_s15 }
 0x12c   :  { %v287_v44 = vadd.f32 %v821_v42, %v264_v41  ;;  %vm540_vm2 = vcmp.lt.s32.totalorder %v1081_v38, 8 }
 0x12e   :  { %v295_v47 = vmax.f32 %v287_v44, 0.0 }
 0x131   :  { %v265_v43 = vpop.f32.mrf.mxu2 }
 0x132   :  { %v266_v45 = vadd.f32 %v265_v43, %v218_v40 }
 0x134   :  { %v288_v46 = vadd.f32 %v821_v42, %v266_v45 }
 0x136   :  { %v296_v48 = vmax.f32 %v288_v46, 0.0 }
 0x138   :  { %v303_v50 = vpack.c.bf16 %v296_v48, %v295_v47 }
 0x139   :  { %v268_v51 = vpop.f32.mrf.mxu2 }
 0x13a   :  { %379 = vmatmul.bf16.vlgmr.msrb.gmra.mxu3 %v303_v50  ;;  %476 = vmatmul.bf16.vlgmr.msrb.gmra.mxu1 %v303_v50  ;;  %v269_v52 = vadd.f32 %v268_v51, %v221_v49 }
 0x13c   :  { %v289_v55 = vadd.f32 %v821_v42, %v269_v52 }
 0x13e   :  { %v297_v59 = vmax.f32 %v289_v55, 0.0 }
 0x141   :  { %v270_v54 = vpop.f32.mrf.mxu2 }
 0x142   :  { %v271_v56 = vadd.f32 %v270_v54, %v223_v53 }
 0x144   :  { %v290_v58 = vadd.f32 %v821_v42, %v271_v56 }
 0x146   :  { %v298_v60 = vmax.f32 %v290_v58, 0.0 }
 0x148   :  { %v304_v61 = vpack.c.bf16 %v298_v60, %v297_v59 }
 0x149   :  { %v273_v62 = vpop.f32.mrf.mxu3 }
 0x14a   :  { %384 = vmatmul.bf16.gmra.mxu3 %v304_v61  ;;  %481 = vmatmul.bf16.gmra.mxu1 %v304_v61  ;;  %v274_v0 = vadd.f32 %v273_v62, %v226_v57 }
 0x14c   :  { %v291_v2 = vadd.f32 %v821_v42, %v274_v0 }
 0x14e   :  { %v299_v9 = vmax.f32 %v291_v2, 0.0 }
 0x151   :  { %v275_v1 = vpop.f32.mrf.mxu3 }
 0x152   :  { %v276_v3 = vadd.f32 %v275_v1, %v228_v63 }
 0x154   :  { %v292_v6 = vadd.f32 %v821_v42, %v276_v3 }
 0x156   :  { %v300_v10 = vmax.f32 %v292_v6, 0.0 }
 0x158   :  { %v305_v12 = vpack.c.bf16 %v300_v10, %v299_v9 }
 0x159   :  { %v278_v13 = vpop.f32.mrf.mxu3 }
 0x15a   :  { %389 = vmatmul.bf16.gmra.mxu3 %v305_v12  ;;  %486 = vmatmul.bf16.gmra.mxu1 %v305_v12  ;;  %v279_v14 = vadd.f32 %v278_v13, %v231_v11 }
 0x15c   :  { %v293_v17 = vadd.f32 %v821_v42, %v279_v14 }
 0x15e   :  { %v301_v20 = vmax.f32 %v293_v17, 0.0 }
 0x161   :  { %v280_v16 = vpop.f32.mrf.mxu3 }
 0x162   :  { %v281_v18 = vadd.f32 %v280_v16, %v233_v15 }
 0x164   :  { %v294_v19 = vadd.f32 %v821_v42, %v281_v18 }
 0x166   :  { %v302_v21 = vmax.f32 %v294_v19, 0.0 }
 0x168   :  { %v306_v22 = vpack.c.bf16 %v302_v21, %v301_v20 }
 0x16a   :  { %394 = vmatmul.bf16.gmra.mxu3 %v306_v22  ;;  %491 = vmatmul.bf16.gmra.mxu1 %v306_v22 }
 0x1b7   :  { %v477_v35 = vpop.f32.mrf.mxu1 }
 0x1bd   :  { %v380_v23 = vpop.f32.mrf.mxu3 }
 0x1bf   :  { %v479_v37 = vpop.f32.mrf.mxu1 }
 0x1c5   :  { %v382_v24 = vpop.f32.mrf.mxu3 }
 0x1c6   :  { %v400_v34 = vpack.c.bf16 %v382_v24, %v380_v23 }
 0x1c7   :  { %v482_v41 = vpop.f32.mrf.mxu1 }
 0x1cd   :  { %v385_v25 = vpop.f32.mrf.mxu3 }
 0x1cf   :  { %v484_v45 = vpop.f32.mrf.mxu1 }
 0x1d5   :  { %v387_v26 = vpop.f32.mrf.mxu3 }
 0x1d6   :  { %v401_v33 = vpack.c.bf16 %v387_v26, %v385_v25 }
 0x1d7   :  { %v487_v52 = vpop.f32.mrf.mxu1 }
 0x1dd   :  { %v390_v27 = vpop.f32.mrf.mxu3 }
 0x1df   :  { %v489_v58 = vpop.f32.mrf.mxu1 }
 0x1e5   :  { %v392_v28 = vpop.f32.mrf.mxu3 }
 0x1e6   :  { %v402_v32 = vpack.c.bf16 %v392_v28, %v390_v27 }
 0x1e7   :  { %v492_v0 = vpop.f32.mrf.mxu1 }
 0x1ed   :  { %v395_v29 = vpop.f32.mrf.mxu3 }
 0x1ef   :  { %v494_v9 = vpop.f32.mrf.mxu1 }
 0x1f5   :  { %v397_v30 = vpop.f32.mrf.mxu3 }
 0x1f6   :  { %v403_v31 = vpack.c.bf16 %v397_v30, %v395_v29 }
 0x1f8   :  { %501 = vmatpush.bf16.msrb.mxu2 %v403_v31 }
 0x1fc   :  { %502 = vmatpush.bf16.msrb.mxu2 %v402_v32 }
 0x200   :  { %503 = vmatpush.bf16.msrb.mxu2 %v401_v33 }
 0x204   :  { %504 = vmatpush.bf16.msrb.mxu2 %v400_v34 }
 0x207   :  { %781 = vmatmul.msk.bf16.vlgmr.msrb.gmra.mxu2 %vm138_vm0, %v1034_v4 }
 0x217   :  { %782 = vmatmul.msk.bf16.gmra.mxu2 %vm138_vm0, %v1041_v5 }
 0x227   :  { %783 = vmatmul.msk.bf16.gmra.mxu2 %vm138_vm0, %v1048_v7 }
 0x237   :  { %784 = vmatmul.msk.bf16.gmra.mxu2 %vm138_vm0, %v1055_v8 }
 0x28a   :  { %v506_v40 = vpop.f32.mrf.mxu2 }
 0x28b   :  { %v507_v4 = vadd.f32 %v506_v40, %v477_v35 }
 0x28d   :  { %v530_v5 = vadd.f32 %v822_v39, %v507_v4 }
 0x28f   :  { %v541_v7 = vsel %vm540_vm2, %v530_v5, -1e+30 }
 0x290   :  { %549 = vmax.xlane.f32.xlu0 %v541_v7 }
 0x292   :  { %v508_v8 = vpop.f32.mrf.mxu2 }
 0x293   :  { %v509_v42 = vadd.f32 %v508_v8, %v479_v37 }
 0x295   :  { %v531_v43 = vadd.f32 %v822_v39, %v509_v42 }
 0x297   :  { %v542_v44 = vsel %vm540_vm2, %v531_v43, -1e+30 }
 0x298   :  { %551 = vmax.xlane.f32.xlu0 %v542_v44 }
 0x29a   :  { %v511_v46 = vpop.f32.mrf.mxu2 }
 0x29b   :  { %v512_v47 = vadd.f32 %v511_v46, %v482_v41 }
 0x29d   :  { %v532_v48 = vadd.f32 %v822_v39, %v512_v47 }
 0x29f   :  { %v543_v49 = vsel %vm540_vm2, %v532_v48, -1e+30 }
 0x2a0   :  { %553 = vmax.xlane.f32.xlu1 %v543_v49 }
 0x2a2   :  { %v513_v50 = vpop.f32.mrf.mxu2 }
 0x2a3   :  { %v514_v51 = vadd.f32 %v513_v50, %v484_v45 }
 0x2a5   :  { %v533_v53 = vadd.f32 %v822_v39, %v514_v51 }
 0x2a7   :  { %v544_v54 = vsel %vm540_vm2, %v533_v53, -1e+30 }
 0x2a8   :  { %555 = vmax.xlane.f32.xlu1 %v544_v54 }
 0x2aa   :  { %v516_v55 = vpop.f32.mrf.mxu2 }
 0x2ab   :  { %v517_v56 = vadd.f32 %v516_v55, %v487_v52 }
 0x2ad   :  { %v534_v57 = vadd.f32 %v822_v39, %v517_v56 }
 0x2af   :  { %v545_v59 = vsel %vm540_vm2, %v534_v57, -1e+30 }
 0x2b0   :  { %557 = vmax.xlane.f32.xlu2 %v545_v59 }
 0x2b2   :  { %v518_v60 = vpop.f32.mrf.mxu2 }
 0x2b3   :  { %v519_v61 = vadd.f32 %v518_v60, %v489_v58 }
 0x2b5   :  { %v535_v62 = vadd.f32 %v822_v39, %v519_v61 }
 0x2b7   :  { %v546_v63 = vsel %vm540_vm2, %v535_v62, -1e+30 }
 0x2b8   :  { %559 = vmax.xlane.f32.xlu2 %v546_v63 }
 0x2ba   :  { %v521_v1 = vpop.f32.mrf.mxu2 }
 0x2bb   :  { %v522_v2 = vadd.f32 %v521_v1, %v492_v0 }
 0x2bd   :  { %v536_v3 = vadd.f32 %v822_v39, %v522_v2 }
 0x2bf   :  { %v547_v6 = vsel %vm540_vm2, %v536_v3, -1e+30 }
 0x2c0   :  { %561 = vmax.xlane.f32.xlu0 %v547_v6 }
 0x2c2   :  { %v523_v10 = vpop.f32.mrf.mxu2 }
 0x2c3   :  { %v524_v11 = vadd.f32 %v523_v10, %v494_v9 }
 0x2c5   :  { %v537_v12 = vadd.f32 %v822_v39, %v524_v11 }
 0x2c7   :  { %v548_v13 = vsel %vm540_vm2, %v537_v12, -1e+30 }
 0x2c8   :  { %563 = vmax.xlane.f32.xlu1 %v548_v13 }
 0x303   :  { %v550_v14 = vpop.xlane.xlu0 %549 }
 0x304   :  { %v565_v15 = vsub.f32 %v541_v7, %v550_v14 }
 0x306   :  { %v573_v16 = vmul.f32 1.442695, %v565_v15 }
 0x308   :  { %823 = vpow2.f32 %v573_v16 }
 0x30b   :  { %v552_v17 = vpop.xlane.xlu0 %551 }
 0x30c   :  { %v1103_v18 = vsub.f32 %v542_v44, %v552_v17 }
 0x30e   :  { %v824_v19 = vpop.eup %823  ;;  %v575_v20 = vmul.f32 1.442695, %v1103_v18 }
 0x30f   :  { %v589_v21 = vsel %vm540_vm2, %v824_v19, 0.0 }
 0x310   :  { %825 = vpow2.f32 %v575_v20  ;;  %597 = vadd.xlane.f32.xlu2 %v589_v21 }
 0x313   :  { %v554_v22 = vpop.xlane.xlu1 %553 }
 0x314   :  { %v1108_v23 = vsub.f32 %v543_v49, %v554_v22 }
 0x316   :  { %v826_v24 = vpop.eup %825  ;;  %v577_v25 = vmul.f32 1.442695, %v1108_v23 }
 0x317   :  { %v590_v26 = vsel %vm540_vm2, %v826_v24, 0.0 }
 0x318   :  { %827 = vpow2.f32 %v577_v25  ;;  %599 = vadd.xlane.f32.xlu0 %v590_v26 }
 0x31b   :  { %v556_v27 = vpop.xlane.xlu1 %555 }
 0x31c   :  { %v568_v28 = vsub.f32 %v544_v54, %v556_v27 }
 0x31e   :  { %v828_v29 = vpop.eup %827  ;;  %v579_v30 = vmul.f32 1.442695, %v568_v28 }
 0x31f   :  { %v591_v31 = vsel %vm540_vm2, %v828_v29, 0.0 }
 0x320   :  { %829 = vpow2.f32 %v579_v30  ;;  %601 = vadd.xlane.f32.xlu1 %v591_v31 }
 0x323   :  { %v558_v32 = vpop.xlane.xlu2 %557 }
 0x324   :  { %v569_v33 = vsub.f32 %v545_v59, %v558_v32 }
 0x326   :  { %v830_v34 = vpop.eup %829  ;;  %v581_v35 = vmul.f32 1.442695, %v569_v33 }
 0x327   :  { %v592_v36 = vsel %vm540_vm2, %v830_v34, 0.0 }
 0x328   :  { %831 = vpow2.f32 %v581_v35  ;;  %603 = vadd.xlane.f32.xlu2 %v592_v36 }
 0x32b   :  { %v560_v37 = vpop.xlane.xlu2 %559 }
 0x32c   :  { %v570_v39 = vsub.f32 %v546_v63, %v560_v37 }
 0x32e   :  { %v832_v40 = vpop.eup %831  ;;  %v583_v4 = vmul.f32 1.442695, %v570_v39 }
 0x32f   :  { %v593_v5 = vsel %vm540_vm2, %v832_v40, 0.0 }
 0x330   :  { %833 = vpow2.f32 %v583_v4  ;;  %605 = vadd.xlane.f32.xlu0 %v593_v5 }
 0x333   :  { %v562_v7 = vpop.xlane.xlu0 %561 }
 0x334   :  { %v571_v41 = vsub.f32 %v547_v6, %v562_v7 }
 0x336   :  { %v834_v8 = vpop.eup %833  ;;  %v585_v42 = vmul.f32 1.442695, %v571_v41 }
 0x337   :  { %v594_v43 = vsel %vm540_vm2, %v834_v8, 0.0 }
 0x338   :  { %835 = vpow2.f32 %v585_v42  ;;  %607 = vadd.xlane.f32.xlu1 %v594_v43 }
 0x33b   :  { %v564_v44 = vpop.xlane.xlu1 %563 }
 0x33c   :  { %v572_v45 = vsub.f32 %v548_v13, %v564_v44 }
 0x33e   :  { %v836_v46 = vpop.eup %835  ;;  %v587_v47 = vmul.f32 1.442695, %v572_v45 }
 0x33f   :  { %v595_v48 = vsel %vm540_vm2, %v836_v46, 0.0 }
 0x340   :  { %837 = vpow2.f32 %v587_v47  ;;  %609 = vadd.xlane.f32.xlu2 %v595_v48 }
 0x346   :  { %v838_v49 = vpop.eup %837 }
 0x347   :  { %v596_v50 = vsel %vm540_vm2, %v838_v49, 0.0 }
 0x348   :  { %611 = vadd.xlane.f32.xlu0 %v596_v50 }
 0x383   :  { %v598_v51 = vpop.xlane.xlu2 %597 }
 0x384   :  { %839 = vlog2.f32 %v598_v51 }
 0x38a   :  { %v840_v52 = vpop.eup %839 }
 0x38b   :  { %v614_v53 = vmul.f32 0.6931472, %v840_v52  ;;  %v600_v54 = vpop.xlane.xlu0 %599 }
 0x38c   :  { %841 = vlog2.f32 %v600_v54 }
 0x38d   :  { %v629_v55 = vsub.f32 %v565_v15, %v614_v53 }
 0x38f   :  { %637 = vst [vmem:[#allocation8] sm:$0xff] %v629_v55 }
 0x392   :  { %v842_v56 = vpop.eup %841 }
 0x393   :  { %v616_v57 = vmul.f32 0.6931472, %v842_v56  ;;  %v602_v58 = vpop.xlane.xlu1 %601 }
 0x394   :  { %843 = vlog2.f32 %v602_v58 }
 0x395   :  { %v630_v59 = vsub.f32 %v1103_v18, %v616_v57 }
 0x397   :  { %638 = vst [vmem:[#allocation8 + $0x8] sm:$0xff] %v630_v59 }
 0x39a   :  { %v844_v60 = vpop.eup %843 }
 0x39b   :  { %v618_v61 = vmul.f32 0.6931472, %v844_v60  ;;  %v604_v38 = vpop.xlane.xlu2 %603 }
 0x39c   :  { %845 = vlog2.f32 %v604_v38 }
 0x39d   :  { %v631_v62 = vsub.f32 %v1108_v23, %v618_v61 }
 0x39f   :  { %639 = vst [vmem:[#allocation8 + $0x10] sm:$0xff] %v631_v62 }
 0x3a2   :  { %v846_v63 = vpop.eup %845 }
 0x3a3   :  { %v620_v0 = vmul.f32 0.6931472, %v846_v63  ;;  %v606_v1 = vpop.xlane.xlu0 %605 }
 0x3a4   :  { %847 = vlog2.f32 %v606_v1 }
 0x3a5   :  { %v632_v2 = vsub.f32 %v568_v28, %v620_v0 }
 0x3a7   :  { %640 = vst [vmem:[#allocation8 + $0x18] sm:$0xff] %v632_v2 }
 0x3aa   :  { %v848_v3 = vpop.eup %847 }
 0x3ab   :  { %v622_v6 = vmul.f32 0.6931472, %v848_v3  ;;  %v608_v9 = vpop.xlane.xlu1 %607 }
 0x3ac   :  { %849 = vlog2.f32 %v608_v9 }
 0x3ad   :  { %v633_v10 = vsub.f32 %v569_v33, %v622_v6 }
 0x3af   :  { %641 = vst [vmem:[#allocation8 + $0x20] sm:$0xff] %v633_v10 }
 0x3b2   :  { %v850_v11 = vpop.eup %849 }
 0x3b3   :  { %v624_v12 = vmul.f32 0.6931472, %v850_v11  ;;  %v610_v13 = vpop.xlane.xlu2 %609 }
 0x3b4   :  { %851 = vlog2.f32 %v610_v13 }
 0x3b5   :  { %v634_v14 = vsub.f32 %v570_v39, %v624_v12 }
 0x3b7   :  { %642 = vst [vmem:[#allocation8 + $0x28] sm:$0xff] %v634_v14 }
 0x3ba   :  { %v852_v15 = vpop.eup %851 }
 0x3bb   :  { %v626_v16 = vmul.f32 0.6931472, %v852_v15  ;;  %v612_v17 = vpop.xlane.xlu0 %611 }
 0x3bc   :  { %853 = vlog2.f32 %v612_v17 }
 0x3bd   :  { %v635_v18 = vsub.f32 %v571_v41, %v626_v16 }
 0x3bf   :  { %643 = vst [vmem:[#allocation8 + $0x30] sm:$0xff] %v635_v18 }
 0x3c2   :  { %v854_v19 = vpop.eup %853 }
 0x3c3   :  { %v628_v20 = vmul.f32 0.6931472, %v854_v19 }
 0x3c5   :  { %v636_v21 = vsub.f32 %v572_v45, %v628_v20 }
 0x3c7   :  { %644 = vst [vmem:[#allocation8 + $0x38] sm:$0xff] %v636_v21 }
 0x3c8   :  { %657 = dma.vmem_to_hbm [thread:$0]  %s650_s15, 1024, %s652_s18, [#allocation4], %s963_s19, %s963_s19, %s964_s5  }
 0x3c9   :  { %955 = dma.done.wait [#allocation4], 1024  }
 0x3ca   :  { %956 = vsyncadd [#allocation4], 4294966272 }
 0x3cb   :  { %662 = vsyncpa [#allocation3], 1 }
 0x3cc   :  { %663 = vsyncpa [#allocation6], 1 }
 0x3cd   :  { %664 = vsyncpa [#allocation4], 1 }

</bundles_post_ra>
